<compile_context>
chip_gen: v5e
topology: v5e:2x2
jax: 0.10.0
libtpu: 0.0.40
codegen_flags: <defaults>
</compile_context>

<pallas_src>
import functools

import jax
import jax.numpy as jnp
from jax import lax
from jax.experimental import pallas as pl
from jax.experimental.pallas import tpu as pltpu

_LANE = 128
_SUBLANE = 8
_EPS = 1e-10
_CHUNK_ROWS = 64            # rows per in-kernel accumulation chunk
_VMEM_BUDGET = 24 << 20     # byte budget for the double-buffered input blocks


def _round_up(x, m):
    return ((x + m - 1) // m) * m


def _bce_partial_kernel(t_ref, p_ref, acc_ref, *, n, tile, chunk,
                        tiles_per_core, needs_mask):
    """Accumulate a per-core (8, 128) partial sum of the BCE terms."""
    step = pl.program_id(1)

    @pl.when(step == 0)
    def _init():
        acc_ref[...] = jnp.zeros_like(acc_ref)

    if needs_mask:
        core = pl.program_id(0)
        # Flat element index of this tile's first element (int32 is fine for
        # any realistic loss input size).
        tile_start = (core * tiles_per_core + step) * (tile * _LANE)
        # Loop-invariant flat index of each element within a chunk (hoisted
        # once per grid step, not rebuilt per fori iteration).
        base_eid = (lax.broadcasted_iota(jnp.int32, (chunk, _LANE), 0) * _LANE
                    + lax.broadcasted_iota(jnp.int32, (chunk, _LANE), 1))

    def body(g, acc):
        off = pl.multiple_of(g * chunk, chunk)
        t = t_ref[pl.ds(off, chunk), :].astype(jnp.float32)
        p = p_ref[pl.ds(off, chunk), :].astype(jnp.float32)

        # (1 - targets.int()): BCE targets are non-negative labels / soft
        # labels, where floor == int-truncation; one VPU op instead of two
        # converts.  eps stays a scalar immediate (no broadcast array).
        one_minus_t_int = 1.0 - jnp.floor(t)

        # jnp.maximum(1 - p, 0) is exact for p <= 1 and blocks any
        # (1 - p) + eps -> (1 + eps) - p folding that would give log(0).
        bce = (t * jnp.log(p + _EPS)
               + one_minus_t_int * jnp.log(jnp.maximum(1.0 - p, 0.0) + _EPS))

        if needs_mask:
            limit = n - (tile_start + off * _LANE)      # scalar, may be <= 0
            bce = jnp.where(base_eid < limit, bce, 0.0)  # pad/stale lanes -> 0

        # (chunk, 128) -> (8, 128): sum groups of 8 sublanes — layout-
        # preserving reshape + pure VPU vreg adds (no per-step XLU reduce).
        return acc + bce.reshape(chunk // _SUBLANE, _SUBLANE, _LANE).sum(axis=0)

    acc = lax.fori_loop(0, tile // chunk, body,
                        jnp.zeros((_SUBLANE, _LANE), jnp.float32))
    acc_ref[...] += acc


def _detect_num_cores():
    """2 TensorCores per chip only on v7x; 1 elsewhere (incl. CPU interpret)."""
    try:
        kind = jax.devices()[0].device_kind.lower()
    except Exception:
        return 1
    return 2 if "v7" in kind else 1


@functools.partial(jax.jit, static_argnames=("tile_rows", "num_cores"))
def classification_loss(targets, predicts, *, tile_rows=4096, num_cores=None):
    assert targets.shape == predicts.shape
    n = targets.size
    bt = jnp.dtype(targets.dtype).itemsize
    bp = jnp.dtype(predicts.dtype).itemsize
    # Native sublane packing: 8 rows for 4-byte, 16 for bf16, 32 for 1-byte.
    sub = _SUBLANE * max(1, 4 // min(bt, bp))

    # Native-dtype, copy-free flatten (no wrapper-side f32 casts).
    t_flat = jnp.ravel(targets)
    p_flat = jnp.ravel(predicts)

    rows = pl.cdiv(n, _LANE)
    rows_p = _round_up(rows, sub)

    # Row tile: as large as requested, clamped to the problem size and to a
    # ~24 MiB budget for the 2 inputs x 2 pipeline buffers.
    tile = _round_up(min(int(tile_rows), rows_p), sub)
    tile = min(tile, rows_p)
    max_tile = max(sub, (_VMEM_BUDGET // (2 * _LANE * (bt + bp))) // sub * sub)
    tile = min(tile, max_tile)
    if tile >= _CHUNK_ROWS:
        tile = (tile // _CHUNK_ROWS) * _CHUNK_ROWS   # tile % chunk == 0
    chunk = min(_CHUNK_ROWS, tile)

    # Minimal pad: only up to the lane/sublane boundary (never up to a tile
    # multiple).  Pad values are well-conditioned (t=0, p=0.5) and masked to
    # an exact 0.0 inside the kernel.
    padded_n = rows_p * _LANE
    if padded_n != n:
        # TODO(synk): a fully copy-free ragged path would need a 1-D /
        # manual-DMA kernel; this pads each input once by < sub*128 elements.
        t_flat = jnp.pad(t_flat, (0, padded_n - n), constant_values=0)
        p_flat = jnp.pad(p_flat, (0, padded_n - n), constant_values=0.5)
    t2 = t_flat.reshape(rows_p, _LANE)
    p2 = p_flat.reshape(rows_p, _LANE)

    num_tiles = pl.cdiv(rows_p, tile)
    cores = _detect_num_cores() if num_cores is None else int(num_cores)
    cores = max(1, min(cores, num_tiles))
    tiles_per_core = pl.cdiv(num_tiles, cores)
    coverage = cores * tiles_per_core * tile * _LANE
    needs_mask = (coverage != n)

    if cores * tiles_per_core == num_tiles:
        def in_map(c, i):
            return (c * tiles_per_core + i, 0)
    else:
        # v7x odd tile counts: keep the 2-way TC split; overflow steps re-read
        # the last valid tile (clamped index) and are masked to zero in-kernel.
        last = num_tiles - 1
        def in_map(c, i):
            return (jnp.minimum(c * tiles_per_core + i, last), 0)

    in_block = pl.BlockSpec((tile, _LANE), in_map)
    out_block = pl.BlockSpec((_SUBLANE, _LANE), lambda c, i: (c, 0))

    kernel = functools.partial(
        _bce_partial_kernel, n=n, tile=tile, chunk=chunk,
        tiles_per_core=tiles_per_core, needs_mask=needs_mask)

    # 2 inputs x 2 pipeline buffers x (tile,128) blocks + headroom.
    vmem_limit = 2 * tile * _LANE * (bt + bp) + (2 << 20)
    vmem_limit = int(max(4 << 20, min(vmem_limit, 48 << 20)))

    cost = pl.CostEstimate(
        flops=10 * coverage,
        transcendentals=2 * coverage,
        bytes_accessed=(bt + bp) * padded_n + cores * _SUBLANE * _LANE * 4)

    partials = pl.pallas_call(
        kernel,
        out_shape=jax.ShapeDtypeStruct((cores * _SUBLANE, _LANE), jnp.float32),
        grid_spec=pltpu.PrefetchScalarGridSpec(
            num_scalar_prefetch=0,
            grid=(cores, tiles_per_core),
            in_specs=[in_block, in_block],
            out_specs=out_block),
        compiler_params=pltpu.CompilerParams(
            # TODO(synk): on v7x verify the leading axis really shards across
            # both TensorCores; if it stays serial, switch to CORE_PARALLEL.
            dimension_semantics=("parallel", "arbitrary"),
            vmem_limit_bytes=vmem_limit),
        cost_estimate=cost,
    )(t2, p2)

    # Tiny (cores*8, 128) final reduce + scale left to XLA (a few us; folding
    # it into the kernel's last step is an optional further optimization).
    return -jnp.sum(partials) / jnp.float32(n)


def _reference_loss(targets, predicts):
    t = targets.astype(jnp.float32)
    p = predicts.astype(jnp.float32)
    bce = t * jnp.log(p + _EPS) + (
        1.0 - t.astype(jnp.int32).astype(jnp.float32)
    ) * jnp.log(1.0 - p + _EPS)
    return -jnp.mean(bce)


if __name__ == "__main__":
    key = jax.random.PRNGKey(0)
    k1, k2, k3, k4 = jax.random.split(key, 4)

    # NCHW-like shapes: batch=2, channels=4, spatial=16x16 (lane-aligned n).
    shape = (2, 4, 16, 16)
    targets = (jax.random.uniform(k1, shape) > 0.5).astype(jnp.float32)
    predicts = jax.random.uniform(k2, shape, minval=0.01, maxval=0.99)

    loss = jax.block_until_ready(classification_loss(targets, predicts))
    ref = _reference_loss(targets, predicts)
    assert jnp.allclose(loss, ref, rtol=1e-5, atol=1e-5), (loss, ref)

    # Ragged, non-lane-aligned shape exercises the in-kernel masking path.
    shape2 = (2, 3, 7, 11)
    targets2 = (jax.random.uniform(k3, shape2) > 0.5).astype(jnp.float32)
    predicts2 = jax.random.uniform(k4, shape2, minval=0.01, maxval=0.99)
    loss2 = jax.block_until_ready(classification_loss(targets2, predicts2))
    ref2 = _reference_loss(targets2, predicts2)
    assert jnp.allclose(loss2, ref2, rtol=1e-5, atol=1e-5), (loss2, ref2)

    print("KERNEL_OK")
</pallas_src>

<mosaic_0001>
module attributes {stable_mosaic.version = 11 : i64} {
  func.func @_bce_partial_kernel(%arg0: i32, %arg1: i32, %arg2: memref<16x128xf32, #tpu.memory_space<vmem>>, %arg3: memref<16x128xf32, #tpu.memory_space<vmem>>, %arg4: memref<8x128xf32, #tpu.memory_space<vmem>>) attributes {dimension_semantics = [#tpu.dimension_semantics<parallel>, #tpu.dimension_semantics<arbitrary>], iteration_bounds = array<i64: 1, 1>, scalar_prefetch = 0 : i64, scratch_operands = 0 : i64, tpu.core_type = #tpu.core_type<tc>, window_params = [{transform_indices = @transform_0, window_bounds = array<i64: 16, 128>}, {transform_indices = @transform_1, window_bounds = array<i64: 16, 128>}, {transform_indices = @transform_2, window_bounds = array<i64: 8, 128>}]} {
    %c0_i32 = arith.constant 0 : i32
    %0 = arith.cmpi eq, %arg1, %c0_i32 : i32
    %1 = arith.extui %0 : i1 to i32
    %c0_i32_0 = arith.constant 0 : i32
    %2 = arith.cmpi ne, %1, %c0_i32_0 : i32
    scf.if %2 {
      %cst_13 = arith.constant 0.000000e+00 : f32
      %32 = vector.broadcast %cst_13 : f32 to vector<8x128xf32>
      %c0_14 = arith.constant 0 : index
      %c0_15 = arith.constant 0 : index
      %33 = vector.load %arg4[%c0_14, %c0_15] : memref<8x128xf32, #tpu.memory_space<vmem>>, vector<8x128xf32>
      tpu.vector_store %arg4[%c0_14, %c0_15], %32 {strides = array<i32>} : memref<8x128xf32, #tpu.memory_space<vmem>>, vector<8x128xf32>,
    } else {
    }
    %cst = arith.constant 0.000000e+00 : f32
    %3 = vector.broadcast %cst : f32 to vector<8x128xf32>
    %c0_i32_1 = arith.constant 0 : i32
    %c16_i32 = arith.constant 16 : i32
    %4 = arith.muli %c0_i32_1, %c16_i32 : i32
    %5 = tpu.assume_multiple %4, 16 : i32
    %6 = arith.index_cast %5 : i32 to index
    %c0 = arith.constant 0 : index
    %7 = vector.load %arg2[%6, %c0] : memref<16x128xf32, #tpu.memory_space<vmem>>, vector<16x128xf32>
    %8 = arith.index_cast %5 : i32 to index
    %c0_2 = arith.constant 0 : index
    %9 = vector.load %arg3[%8, %c0_2] : memref<16x128xf32, #tpu.memory_space<vmem>>, vector<16x128xf32>
    %10 = math.floor %7 : vector<16x128xf32>
    %cst_3 = arith.constant 1.000000e+00 : f32
    %11 = vector.broadcast %cst_3 : f32 to vector<16x128xf32>
    %12 = arith.subf %11, %10 : vector<16x128xf32>
    %cst_4 = arith.constant 1.000000e-10 : f32
    %13 = vector.broadcast %cst_4 : f32 to vector<16x128xf32>
    %14 = arith.addf %9, %13 : vector<16x128xf32>
    %15 = math.log %14 : vector<16x128xf32>
    %16 = arith.mulf %7, %15 : vector<16x128xf32>
    %cst_5 = arith.constant 1.000000e+00 : f32
    %17 = vector.broadcast %cst_5 : f32 to vector<16x128xf32>
    %18 = arith.subf %17, %9 : vector<16x128xf32>
    %cst_6 = arith.constant 0.000000e+00 : f32
    %19 = vector.broadcast %cst_6 : f32 to vector<16x128xf32>
    %20 = arith.maximumf %18, %19 : vector<16x128xf32>
    %cst_7 = arith.constant 1.000000e-10 : f32
    %21 = vector.broadcast %cst_7 : f32 to vector<16x128xf32>
    %22 = arith.addf %20, %21 : vector<16x128xf32>
    %23 = math.log %22 : vector<16x128xf32>
    %24 = arith.mulf %12, %23 : vector<16x128xf32>
    %25 = arith.addf %16, %24 : vector<16x128xf32>
    %26 = vector.shape_cast %25 : vector<16x128xf32> to vector<2x8x128xf32>
    %cst_8 = arith.constant dense<0.000000e+00> : vector<8x128xf32>
    %27 = vector.multi_reduction <add>, %26, %cst_8 [0] : vector<2x8x128xf32> to vector<8x128xf32>
    %28 = arith.addf %3, %27 : vector<8x128xf32>
    %c1_i32 = arith.constant 1 : i32
    %c0_9 = arith.constant 0 : index
    %c0_10 = arith.constant 0 : index
    %29 = vector.load %arg4[%c0_9, %c0_10] : memref<8x128xf32, #tpu.memory_space<vmem>>, vector<8x128xf32>
    %30 = arith.addf %29, %28 : vector<8x128xf32>
    %c0_11 = arith.constant 0 : index
    %c0_12 = arith.constant 0 : index
    %31 = vector.load %arg4[%c0_11, %c0_12] : memref<8x128xf32, #tpu.memory_space<vmem>>, vector<8x128xf32>
    tpu.vector_store %arg4[%c0_11, %c0_12], %30 {strides = array<i32>} : memref<8x128xf32, #tpu.memory_space<vmem>>, vector<8x128xf32>,
    return
  }
  func.func @transform_0(%arg0: i32, %arg1: i32) -> (i32, i32) {
    %c1_i32 = arith.constant 1 : i32
    %0 = arith.muli %arg0, %c1_i32 : i32
    %1 = arith.addi %0, %arg1 : i32
    %c0_i32 = arith.constant 0 : i32
    %c0_i32_0 = arith.constant 0 : i32
    return %1, %c0_i32 : i32, i32
  }
  func.func @transform_1(%arg0: i32, %arg1: i32) -> (i32, i32) {
    %c1_i32 = arith.constant 1 : i32
    %0 = arith.muli %arg0, %c1_i32 : i32
    %1 = arith.addi %0, %arg1 : i32
    %c0_i32 = arith.constant 0 : i32
    %c0_i32_0 = arith.constant 0 : i32
    return %1, %c0_i32 : i32, i32
  }
  func.func @transform_2(%arg0: i32, %arg1: i32) -> (i32, i32) {
    %c0_i32 = arith.constant 0 : i32
    %c0_i32_0 = arith.constant 0 : i32
    return %arg0, %c0_i32 : i32, i32
  }
}

</mosaic_0001>

<bundles_post_ra>
// kernel: classification_loss.1
= control target key start
LH: loop header
LB: loop body
LE: loop exit
PB: predicated region body
PF: predicated region fallthrough
CT: control target
= control target key end

     0   :  { %s150_s1 = inlined_call_operand.vmem [shape: f32[16,128], index: 1, kind: input, shape index: {}]   ;;  %s151_s0 = inlined_call_operand.vmem [shape: f32[16,128], index: 0, kind: input, shape index: {}]   ;;  %s152_s2 = inlined_call_operand.vmem [shape: f32[8,128], index: 2, kind: output, shape index: {}]  }
   0x1   :  { %v62_v0 = vld [vmem:[%s150_s1] sm:$0xff]  ;;  %v63_v1 = vld [vmem:[%s150_s1 + $0x8] sm:$0xff] }
   0x2   :  { %v68_v2 = vadd.f32 1e-10, %v62_v0  ;;  %v76_v3 = vsub.f32 1.0, %v62_v0  ;;  %v69_v4 = vadd.f32 1e-10, %v63_v1  ;;  %v77_v5 = vsub.f32 1.0, %v63_v1 }
   0x3   :  { %v60_v8 = vld [vmem:[%s151_s0] sm:$0xff]  ;;  %v61_v10 = vld [vmem:[%s151_s0 + $0x8] sm:$0xff] }
   0x4   :  { %112 = vlog2.f32 %v68_v2  ;;  %v78_v6 = vmax.f32 %v76_v3, 0.0  ;;  %v79_v7 = vmax.f32 %v77_v5, 0.0  ;;  %v64_v12 = vfloor.f32 %v60_v8 }
   0x5   :  { %114 = vlog2.f32 %v69_v4  ;;  %v65_v14 = vfloor.f32 %v61_v10 }
   0x6   :  { %v80_v9 = vadd.f32 1e-10, %v78_v6  ;;  %v81_v11 = vadd.f32 1e-10, %v79_v7  ;;  %v66_v18 = vsub.f32 1.0, %v64_v12 }
   0x7   :  { %v67_v20 = vsub.f32 1.0, %v65_v14 }
   0x8   :  { %116 = vlog2.f32 %v80_v9 }
   0x9   :  { %118 = vlog2.f32 %v81_v11 }
   0xa   :  { %v113_v13 = vpop.eup %112 }
   0xb   :  { %v115_v15 = vpop.eup %114  ;;  %v71_v16 = vmul.f32 0.6931472, %v113_v13 }
   0xc   :  { %v73_v17 = vmul.f32 0.6931472, %v115_v15 }
   0xd   :  { %v74_v22 = vmul.f32 %v71_v16, %v60_v8 }
   0xe   :  { %v117_v19 = vpop.eup %116  ;;  %v75_v24 = vmul.f32 %v73_v17, %v61_v10 }
   0xf   :  { %v119_v21 = vpop.eup %118  ;;  %v83_v23 = vmul.f32 0.6931472, %v117_v19 }
  0x10   :  { %v85_v25 = vmul.f32 0.6931472, %v119_v21 }
  0x11   :  { %v86_v26 = vmul.f32 %v83_v23, %v66_v18 }
  0x12   :  { %v87_v27 = vmul.f32 %v85_v25, %v67_v20 }
  0x13   :  { %v88_v28 = vadd.f32 %v86_v26, %v74_v22 }
  0x14   :  { %v89_v29 = vadd.f32 %v87_v27, %v75_v24 }
  0x16   :  { %v90_v30 = vadd.f32 %v89_v29, %v88_v28 }
  0x18   :  { %94 = vst [vmem:[%s152_s2] sm:$0xff] %v90_v30 }

</bundles_post_ra>
